<compile_context>
chip_gen: v5e
topology: v5e:2x2
jax: 0.10.0
libtpu: 0.0.40
codegen_flags: <defaults>
</compile_context>

<pallas_src>
import functools

import jax
import jax.numpy as jnp
from jax.experimental import pallas as pl
from jax.experimental.pallas import tpu as pltpu

BN_EPS = 1e-5
LANE = 128


def _round_up(x, m):
    return ((x + m - 1) // m) * m


def _full_spec(shape):
    # Single block covering the whole (small) array; whole-array blocks are
    # exempt from the (8,128) tiling constraint.
    return pl.BlockSpec(shape, lambda: tuple(0 for _ in shape))


# ------------------------------------------------------------------ kernel

def _bn_relu(z, gamma, beta):
    """Training-mode BatchNorm1d (biased var, eps=1e-5) folded to a single
    scale+shift, then ReLU.  One-pass stats in f32."""
    n = z.shape[0]
    inv_n = 1.0 / n
    mean = jnp.sum(z, axis=0, keepdims=True) * inv_n                 # (1, D)
    mean_sq = jnp.sum(z * z, axis=0, keepdims=True) * inv_n          # (1, D)
    var = jnp.maximum(mean_sq - mean * mean, 0.0)                    # (1, D)
    scale = gamma * jax.lax.rsqrt(var + BN_EPS)                      # (1, D)
    shift = beta - mean * scale                                      # (1, D)
    return jnp.maximum(z * scale + shift, 0.0)


def _make_graphcnn_kernel(num_layers, num_mlp_layers, average):
    """Returns a kernel body closed over the (static) network structure.

    Kernel refs layout:
      refs[0]   : adj        (N, N)
      refs[1]   : x (padded) (N, Din_pad)
      refs[2:-1]: flat params, per GNN layer:
                    num_mlp_layers > 1:
                      [w0, g0, b0, ..., w_{L-2}, g_{L-2}, b_{L-2}, w_{L-1},
                       g_out, b_out]
                    num_mlp_layers == 1:
                      [w0, g_out, b_out]
      refs[-1]  : output     (N, Dh_pad)
    """

    def kernel(*refs):
        adj_ref, x_ref = refs[0], refs[1]
        o_ref = refs[-1]
        p = refs[2:-1]

        adj = adj_ref[...]                              # (N, N)
        h = x_ref[...]                                  # (N, Din_pad)

        if average:
            # degree = adj @ ones == row-sum; hoisted out of the layer loop.
            deg = jnp.sum(adj, axis=1, keepdims=True)   # (N, 1)
            inv_deg = 1.0 / deg

        idx = 0
        for _layer in range(num_layers):
            pooled = jnp.dot(adj, h, preferred_element_type=jnp.float32)
            if average:
                pooled = pooled * inv_deg

            hcur = pooled
            if num_mlp_layers == 1:
                hcur = jnp.dot(hcur, p[idx][...],
                               preferred_element_type=jnp.float32)
                idx += 1
            else:
                for _ml in range(num_mlp_layers - 1):
                    z = jnp.dot(hcur, p[idx][...],
                                preferred_element_type=jnp.float32)
                    hcur = _bn_relu(z, p[idx + 1][...], p[idx + 2][...])
                    idx += 3
                hcur = jnp.dot(hcur, p[idx][...],
                               preferred_element_type=jnp.float32)
                idx += 1

            # Outer GraphCNN BatchNorm1d + ReLU.
            h = _bn_relu(hcur, p[idx][...], p[idx + 1][...])
            idx += 2

        o_ref[...] = h.astype(o_ref.dtype)

    return kernel


# ------------------------------------------------------------------ params

def init_graphcnn_params(key, num_layers, num_mlp_layers, input_dim, hidden_dim):
    """PyTorch-style init. Weights stored in nn.Linear layout (out, in)."""
    if num_mlp_layers < 1:
        raise ValueError("number of layers should be positive!")
    params = {"mlps": [], "bn": []}
    for layer in range(num_layers):
        in_dim = input_dim if layer == 0 else hidden_dim
        dims = [in_dim] + [hidden_dim] * (num_mlp_layers - 1) + [hidden_dim]
        mlp = {"linears": [], "bn": []}
        for i in range(num_mlp_layers):
            fan_in, fan_out = dims[i], dims[i + 1]
            key, kw, kb = jax.random.split(key, 3)
            bound = float(fan_in) ** -0.5
            w = jax.random.uniform(kw, (fan_out, fan_in), jnp.float32, -bound, bound)
            b = jax.random.uniform(kb, (fan_out,), jnp.float32, -bound, bound)
            mlp["linears"].append((w, b))
        for _ in range(num_mlp_layers - 1):
            key, kg, kbt = jax.random.split(key, 3)
            gamma = jax.random.uniform(kg, (hidden_dim,), jnp.float32, 0.5, 1.5)
            beta = 0.1 * jax.random.normal(kbt, (hidden_dim,), jnp.float32)
            mlp["bn"].append((gamma, beta))
        params["mlps"].append(mlp)
        key, kg, kbt = jax.random.split(key, 3)
        gamma = jax.random.uniform(kg, (hidden_dim,), jnp.float32, 0.5, 1.5)
        beta = 0.1 * jax.random.normal(kbt, (hidden_dim,), jnp.float32)
        params["bn"].append((gamma, beta))
    return params


def prepare_params(params, num_layers, num_mlp_layers, input_dim, hidden_dim):
    """One-time host-side prep: transpose each weight to (in, out), zero-pad
    feature dims to a multiple of 128, drop Linear biases (each Linear is
    followed by a training-mode BN, so the bias cancels exactly)."""
    din_pad = _round_up(input_dim, LANE)
    dh_pad = _round_up(hidden_dim, LANE)

    def pad_w(w, in_pad, out_pad):
        out_d, in_d = w.shape
        return jnp.zeros((in_pad, out_pad), jnp.float32).at[:in_d, :out_d].set(w.T)

    def pad_v(v, d_pad):
        return jnp.zeros((1, d_pad), jnp.float32).at[0, : v.shape[0]].set(v)

    flat = []
    for layer in range(num_layers):
        mlp = params["mlps"][layer]
        first_in_pad = din_pad if layer == 0 else dh_pad
        if num_mlp_layers == 1:
            w, _b = mlp["linears"][0]
            flat.append(pad_w(w, first_in_pad, dh_pad))
        else:
            for ml in range(num_mlp_layers - 1):
                w, _b = mlp["linears"][ml]
                g, be = mlp["bn"][ml]
                flat += [pad_w(w, first_in_pad if ml == 0 else dh_pad, dh_pad),
                         pad_v(g, dh_pad), pad_v(be, dh_pad)]
            w, _b = mlp["linears"][num_mlp_layers - 1]
            flat.append(pad_w(w, dh_pad, dh_pad))
        g, be = params["bn"][layer]
        flat += [pad_v(g, dh_pad), pad_v(be, dh_pad)]
    return tuple(flat)


# ------------------------------------------------------------------ forward

@functools.partial(
    jax.jit,
    static_argnames=("num_layers", "num_mlp_layers", "average", "hidden_dim"))
def graphcnn_forward(flat_params, feats, adj, *, num_layers, num_mlp_layers,
                     average, hidden_dim):
    n, input_dim = feats.shape
    din_pad = _round_up(input_dim, LANE)
    dh_pad = _round_up(hidden_dim, LANE)

    # Lane-pad the node features once at the kernel boundary.
    x_pad = jnp.zeros((n, din_pad), jnp.float32).at[:, :input_dim].set(feats)

    kernel = _make_graphcnn_kernel(num_layers, num_mlp_layers, average)
    out_pad = pl.pallas_call(
        kernel,
        out_shape=jax.ShapeDtypeStruct((n, dh_pad), jnp.float32),
        in_specs=[_full_spec(adj.shape), _full_spec(x_pad.shape)]
                 + [_full_spec(a.shape) for a in flat_params],
        out_specs=_full_spec((n, dh_pad)),
        compiler_params=pltpu.CompilerParams(
            vmem_limit_bytes=32 * 1024 * 1024),
    )(adj, x_pad, *flat_params)

    return out_pad[:, :hidden_dim]


# ------------------------------------------------------------------ reference

def ref_forward(params, feats, adj, *, num_layers, num_mlp_layers, average):
    """Pure-JAX faithful translation of the PyTorch module (keeps biases,
    two-pass BN stats)."""

    def bn_train(z, gamma, beta):
        mean = z.mean(axis=0, keepdims=True)
        var = ((z - mean) ** 2).mean(axis=0, keepdims=True)
        return gamma * (z - mean) / jnp.sqrt(var + BN_EPS) + beta

    h = feats
    if average:
        deg = adj @ jnp.ones((adj.shape[0], 1), jnp.float32)
    for layer in range(num_layers):
        pooled = adj @ h
        if average:
            pooled = pooled / deg
        mlp = params["mlps"][layer]
        hc = pooled
        if num_mlp_layers == 1:
            w, b = mlp["linears"][0]
            hc = hc @ w.T + b
        else:
            for ml in range(num_mlp_layers - 1):
                w, b = mlp["linears"][ml]
                g, be = mlp["bn"][ml]
                hc = jnp.maximum(bn_train(hc @ w.T + b, g, be), 0.0)
            w, b = mlp["linears"][num_mlp_layers - 1]
            hc = hc @ w.T + b
        g, be = params["bn"][layer]
        h = jnp.maximum(bn_train(hc, g, be), 0.0)
    return h


# ------------------------------------------------------------------ main

if __name__ == "__main__":
    num_layers = 2          # GNN layers
    num_mlp_layers = 2      # layers per MLP
    n_nodes = 16
    input_dim = 16
    hidden_dim = 32
    neighbor_pooling_type = "average"
    average = neighbor_pooling_type == "average"

    key = jax.random.PRNGKey(0)
    key, kx, ka = jax.random.split(key, 3)
    feats = jax.random.normal(kx, (n_nodes, input_dim), jnp.float32)

    # Random symmetric adjacency with self-loops (every node has degree > 0).
    a = (jax.random.uniform(ka, (n_nodes, n_nodes)) < 0.3).astype(jnp.float32)
    adj = jnp.maximum(jnp.maximum(a, a.T), jnp.eye(n_nodes, dtype=jnp.float32))

    params = init_graphcnn_params(key, num_layers, num_mlp_layers,
                                  input_dim, hidden_dim)
    flat = prepare_params(params, num_layers, num_mlp_layers,
                          input_dim, hidden_dim)

    out = graphcnn_forward(flat, feats, adj,
                           num_layers=num_layers,
                           num_mlp_layers=num_mlp_layers,
                           average=average,
                           hidden_dim=hidden_dim)
    jax.block_until_ready(out)

    ref = ref_forward(params, feats, adj, num_layers=num_layers,
                      num_mlp_layers=num_mlp_layers, average=average)

    assert out.shape == (n_nodes, hidden_dim)
    max_err = float(jnp.max(jnp.abs(out - ref)))
    assert jnp.allclose(out, ref, atol=1e-4, rtol=1e-4), max_err

    print("KERNEL_OK")
</pallas_src>

<mosaic_0001>
module attributes {stable_mosaic.version = 11 : i64} {
  func.func @kernel(%arg0: memref<16x16xf32, #tpu.memory_space<vmem>>, %arg1: memref<16x128xf32, #tpu.memory_space<vmem>>, %arg2: memref<128x128xf32, #tpu.memory_space<vmem>>, %arg3: memref<1x128xf32, #tpu.memory_space<vmem>>, %arg4: memref<1x128xf32, #tpu.memory_space<vmem>>, %arg5: memref<128x128xf32, #tpu.memory_space<vmem>>, %arg6: memref<1x128xf32, #tpu.memory_space<vmem>>, %arg7: memref<1x128xf32, #tpu.memory_space<vmem>>, %arg8: memref<128x128xf32, #tpu.memory_space<vmem>>, %arg9: memref<1x128xf32, #tpu.memory_space<vmem>>, %arg10: memref<1x128xf32, #tpu.memory_space<vmem>>, %arg11: memref<128x128xf32, #tpu.memory_space<vmem>>, %arg12: memref<1x128xf32, #tpu.memory_space<vmem>>, %arg13: memref<1x128xf32, #tpu.memory_space<vmem>>, %arg14: memref<16x128xf32, #tpu.memory_space<vmem>>) attributes {dimension_semantics = [], scalar_prefetch = 0 : i64, scratch_operands = 0 : i64, tpu.core_type = #tpu.core_type<tc>} {
    %c0 = arith.constant 0 : index
    %c0_0 = arith.constant 0 : index
    %0 = vector.load %arg0[%c0, %c0_0] : memref<16x16xf32, #tpu.memory_space<vmem>>, vector<16x16xf32>
    %c0_1 = arith.constant 0 : index
    %c0_2 = arith.constant 0 : index
    %1 = vector.load %arg1[%c0_1, %c0_2] : memref<16x128xf32, #tpu.memory_space<vmem>>, vector<16x128xf32>
    %cst = arith.constant dense<0.000000e+00> : vector<16xf32>
    %2 = vector.multi_reduction <add>, %0, %cst [1] : vector<16x16xf32> to vector<16xf32>
    %3 = vector.shape_cast %2 : vector<16xf32> to vector<16x1xf32>
    %cst_3 = arith.constant 1.000000e+00 : f32
    %4 = vector.broadcast %cst_3 : f32 to vector<16x1xf32>
    %5 = arith.divf %4, %3 : vector<16x1xf32>
    %cst_4 = arith.constant dense<0.000000e+00> : vector<16x128xf32>
    %6 = tpu.matmul %0, %1, %cst_4 {dimension_numbers = #tpu.dot_dimension_numbers<[1], [0], [0], [1], [0, 0, 1, 1], [], []>} : vector<16x16xf32>, vector<16x128xf32>, vector<16x128xf32> -> vector<16x128xf32>
    %7 = vector.broadcast %5 : vector<16x1xf32> to vector<16x128xf32>
    %8 = arith.mulf %6, %7 : vector<16x128xf32>
    %c0_5 = arith.constant 0 : index
    %c0_6 = arith.constant 0 : index
    %9 = vector.load %arg2[%c0_5, %c0_6] : memref<128x128xf32, #tpu.memory_space<vmem>>, vector<128x128xf32>
    %cst_7 = arith.constant dense<0.000000e+00> : vector<16x128xf32>
    %10 = tpu.matmul %8, %9, %cst_7 {dimension_numbers = #tpu.dot_dimension_numbers<[1], [0], [0], [1], [0, 0, 1, 1], [], []>} : vector<16x128xf32>, vector<128x128xf32>, vector<16x128xf32> -> vector<16x128xf32>
    %c0_8 = arith.constant 0 : index
    %c0_9 = arith.constant 0 : index
    %11 = vector.load %arg3[%c0_8, %c0_9] : memref<1x128xf32, #tpu.memory_space<vmem>>, vector<1x128xf32>
    %c0_10 = arith.constant 0 : index
    %c0_11 = arith.constant 0 : index
    %12 = vector.load %arg4[%c0_10, %c0_11] : memref<1x128xf32, #tpu.memory_space<vmem>>, vector<1x128xf32>
    %cst_12 = arith.constant dense<0.000000e+00> : vector<128xf32>
    %13 = vector.multi_reduction <add>, %10, %cst_12 [0] : vector<16x128xf32> to vector<128xf32>
    %14 = vector.shape_cast %13 : vector<128xf32> to vector<1x128xf32>
    %cst_13 = arith.constant 6.250000e-02 : f32
    %15 = vector.broadcast %cst_13 : f32 to vector<1x128xf32>
    %16 = arith.mulf %14, %15 : vector<1x128xf32>
    %17 = arith.mulf %10, %10 : vector<16x128xf32>
    %cst_14 = arith.constant dense<0.000000e+00> : vector<128xf32>
    %18 = vector.multi_reduction <add>, %17, %cst_14 [0] : vector<16x128xf32> to vector<128xf32>
    %19 = vector.shape_cast %18 : vector<128xf32> to vector<1x128xf32>
    %cst_15 = arith.constant 6.250000e-02 : f32
    %20 = vector.broadcast %cst_15 : f32 to vector<1x128xf32>
    %21 = arith.mulf %19, %20 : vector<1x128xf32>
    %22 = arith.mulf %16, %16 : vector<1x128xf32>
    %23 = arith.subf %21, %22 : vector<1x128xf32>
    %cst_16 = arith.constant 0.000000e+00 : f32
    %24 = vector.broadcast %cst_16 : f32 to vector<1x128xf32>
    %25 = arith.maximumf %23, %24 : vector<1x128xf32>
    %cst_17 = arith.constant 9.99999974E-6 : f32
    %26 = vector.broadcast %cst_17 : f32 to vector<1x128xf32>
    %27 = arith.addf %25, %26 : vector<1x128xf32>
    %28 = math.rsqrt %27 : vector<1x128xf32>
    %29 = arith.mulf %11, %28 : vector<1x128xf32>
    %30 = arith.mulf %16, %29 : vector<1x128xf32>
    %31 = arith.subf %12, %30 : vector<1x128xf32>
    %32 = vector.broadcast %29 : vector<1x128xf32> to vector<16x128xf32>
    %33 = arith.mulf %10, %32 : vector<16x128xf32>
    %34 = vector.broadcast %31 : vector<1x128xf32> to vector<16x128xf32>
    %35 = arith.addf %33, %34 : vector<16x128xf32>
    %cst_18 = arith.constant 0.000000e+00 : f32
    %36 = vector.broadcast %cst_18 : f32 to vector<16x128xf32>
    %37 = arith.maximumf %35, %36 : vector<16x128xf32>
    %c0_19 = arith.constant 0 : index
    %c0_20 = arith.constant 0 : index
    %38 = vector.load %arg5[%c0_19, %c0_20] : memref<128x128xf32, #tpu.memory_space<vmem>>, vector<128x128xf32>
    %cst_21 = arith.constant dense<0.000000e+00> : vector<16x128xf32>
    %39 = tpu.matmul %37, %38, %cst_21 {dimension_numbers = #tpu.dot_dimension_numbers<[1], [0], [0], [1], [0, 0, 1, 1], [], []>} : vector<16x128xf32>, vector<128x128xf32>, vector<16x128xf32> -> vector<16x128xf32>
    %c0_22 = arith.constant 0 : index
    %c0_23 = arith.constant 0 : index
    %40 = vector.load %arg6[%c0_22, %c0_23] : memref<1x128xf32, #tpu.memory_space<vmem>>, vector<1x128xf32>
    %c0_24 = arith.constant 0 : index
    %c0_25 = arith.constant 0 : index
    %41 = vector.load %arg7[%c0_24, %c0_25] : memref<1x128xf32, #tpu.memory_space<vmem>>, vector<1x128xf32>
    %cst_26 = arith.constant dense<0.000000e+00> : vector<128xf32>
    %42 = vector.multi_reduction <add>, %39, %cst_26 [0] : vector<16x128xf32> to vector<128xf32>
    %43 = vector.shape_cast %42 : vector<128xf32> to vector<1x128xf32>
    %cst_27 = arith.constant 6.250000e-02 : f32
    %44 = vector.broadcast %cst_27 : f32 to vector<1x128xf32>
    %45 = arith.mulf %43, %44 : vector<1x128xf32>
    %46 = arith.mulf %39, %39 : vector<16x128xf32>
    %cst_28 = arith.constant dense<0.000000e+00> : vector<128xf32>
    %47 = vector.multi_reduction <add>, %46, %cst_28 [0] : vector<16x128xf32> to vector<128xf32>
    %48 = vector.shape_cast %47 : vector<128xf32> to vector<1x128xf32>
    %cst_29 = arith.constant 6.250000e-02 : f32
    %49 = vector.broadcast %cst_29 : f32 to vector<1x128xf32>
    %50 = arith.mulf %48, %49 : vector<1x128xf32>
    %51 = arith.mulf %45, %45 : vector<1x128xf32>
    %52 = arith.subf %50, %51 : vector<1x128xf32>
    %cst_30 = arith.constant 0.000000e+00 : f32
    %53 = vector.broadcast %cst_30 : f32 to vector<1x128xf32>
    %54 = arith.maximumf %52, %53 : vector<1x128xf32>
    %cst_31 = arith.constant 9.99999974E-6 : f32
    %55 = vector.broadcast %cst_31 : f32 to vector<1x128xf32>
    %56 = arith.addf %54, %55 : vector<1x128xf32>
    %57 = math.rsqrt %56 : vector<1x128xf32>
    %58 = arith.mulf %40, %57 : vector<1x128xf32>
    %59 = arith.mulf %45, %58 : vector<1x128xf32>
    %60 = arith.subf %41, %59 : vector<1x128xf32>
    %61 = vector.broadcast %58 : vector<1x128xf32> to vector<16x128xf32>
    %62 = arith.mulf %39, %61 : vector<16x128xf32>
    %63 = vector.broadcast %60 : vector<1x128xf32> to vector<16x128xf32>
    %64 = arith.addf %62, %63 : vector<16x128xf32>
    %cst_32 = arith.constant 0.000000e+00 : f32
    %65 = vector.broadcast %cst_32 : f32 to vector<16x128xf32>
    %66 = arith.maximumf %64, %65 : vector<16x128xf32>
    %cst_33 = arith.constant dense<0.000000e+00> : vector<16x128xf32>
    %67 = tpu.matmul %0, %66, %cst_33 {dimension_numbers = #tpu.dot_dimension_numbers<[1], [0], [0], [1], [0, 0, 1, 1], [], []>} : vector<16x16xf32>, vector<16x128xf32>, vector<16x128xf32> -> vector<16x128xf32>
    %68 = vector.broadcast %5 : vector<16x1xf32> to vector<16x128xf32>
    %69 = arith.mulf %67, %68 : vector<16x128xf32>
    %c0_34 = arith.constant 0 : index
    %c0_35 = arith.constant 0 : index
    %70 = vector.load %arg8[%c0_34, %c0_35] : memref<128x128xf32, #tpu.memory_space<vmem>>, vector<128x128xf32>
    %cst_36 = arith.constant dense<0.000000e+00> : vector<16x128xf32>
    %71 = tpu.matmul %69, %70, %cst_36 {dimension_numbers = #tpu.dot_dimension_numbers<[1], [0], [0], [1], [0, 0, 1, 1], [], []>} : vector<16x128xf32>, vector<128x128xf32>, vector<16x128xf32> -> vector<16x128xf32>
    %c0_37 = arith.constant 0 : index
    %c0_38 = arith.constant 0 : index
    %72 = vector.load %arg9[%c0_37, %c0_38] : memref<1x128xf32, #tpu.memory_space<vmem>>, vector<1x128xf32>
    %c0_39 = arith.constant 0 : index
    %c0_40 = arith.constant 0 : index
    %73 = vector.load %arg10[%c0_39, %c0_40] : memref<1x128xf32, #tpu.memory_space<vmem>>, vector<1x128xf32>
    %cst_41 = arith.constant dense<0.000000e+00> : vector<128xf32>
    %74 = vector.multi_reduction <add>, %71, %cst_41 [0] : vector<16x128xf32> to vector<128xf32>
    %75 = vector.shape_cast %74 : vector<128xf32> to vector<1x128xf32>
    %cst_42 = arith.constant 6.250000e-02 : f32
    %76 = vector.broadcast %cst_42 : f32 to vector<1x128xf32>
    %77 = arith.mulf %75, %76 : vector<1x128xf32>
    %78 = arith.mulf %71, %71 : vector<16x128xf32>
    %cst_43 = arith.constant dense<0.000000e+00> : vector<128xf32>
    %79 = vector.multi_reduction <add>, %78, %cst_43 [0] : vector<16x128xf32> to vector<128xf32>
    %80 = vector.shape_cast %79 : vector<128xf32> to vector<1x128xf32>
    %cst_44 = arith.constant 6.250000e-02 : f32
    %81 = vector.broadcast %cst_44 : f32 to vector<1x128xf32>
    %82 = arith.mulf %80, %81 : vector<1x128xf32>
    %83 = arith.mulf %77, %77 : vector<1x128xf32>
    %84 = arith.subf %82, %83 : vector<1x128xf32>
    %cst_45 = arith.constant 0.000000e+00 : f32
    %85 = vector.broadcast %cst_45 : f32 to vector<1x128xf32>
    %86 = arith.maximumf %84, %85 : vector<1x128xf32>
    %cst_46 = arith.constant 9.99999974E-6 : f32
    %87 = vector.broadcast %cst_46 : f32 to vector<1x128xf32>
    %88 = arith.addf %86, %87 : vector<1x128xf32>
    %89 = math.rsqrt %88 : vector<1x128xf32>
    %90 = arith.mulf %72, %89 : vector<1x128xf32>
    %91 = arith.mulf %77, %90 : vector<1x128xf32>
    %92 = arith.subf %73, %91 : vector<1x128xf32>
    %93 = vector.broadcast %90 : vector<1x128xf32> to vector<16x128xf32>
    %94 = arith.mulf %71, %93 : vector<16x128xf32>
    %95 = vector.broadcast %92 : vector<1x128xf32> to vector<16x128xf32>
    %96 = arith.addf %94, %95 : vector<16x128xf32>
    %cst_47 = arith.constant 0.000000e+00 : f32
    %97 = vector.broadcast %cst_47 : f32 to vector<16x128xf32>
    %98 = arith.maximumf %96, %97 : vector<16x128xf32>
    %c0_48 = arith.constant 0 : index
    %c0_49 = arith.constant 0 : index
    %99 = vector.load %arg11[%c0_48, %c0_49] : memref<128x128xf32, #tpu.memory_space<vmem>>, vector<128x128xf32>
    %cst_50 = arith.constant dense<0.000000e+00> : vector<16x128xf32>
    %100 = tpu.matmul %98, %99, %cst_50 {dimension_numbers = #tpu.dot_dimension_numbers<[1], [0], [0], [1], [0, 0, 1, 1], [], []>} : vector<16x128xf32>, vector<128x128xf32>, vector<16x128xf32> -> vector<16x128xf32>
    %c0_51 = arith.constant 0 : index
    %c0_52 = arith.constant 0 : index
    %101 = vector.load %arg12[%c0_51, %c0_52] : memref<1x128xf32, #tpu.memory_space<vmem>>, vector<1x128xf32>
    %c0_53 = arith.constant 0 : index
    %c0_54 = arith.constant 0 : index
    %102 = vector.load %arg13[%c0_53, %c0_54] : memref<1x128xf32, #tpu.memory_space<vmem>>, vector<1x128xf32>
    %cst_55 = arith.constant dense<0.000000e+00> : vector<128xf32>
    %103 = vector.multi_reduction <add>, %100, %cst_55 [0] : vector<16x128xf32> to vector<128xf32>
    %104 = vector.shape_cast %103 : vector<128xf32> to vector<1x128xf32>
    %cst_56 = arith.constant 6.250000e-02 : f32
    %105 = vector.broadcast %cst_56 : f32 to vector<1x128xf32>
    %106 = arith.mulf %104, %105 : vector<1x128xf32>
    %107 = arith.mulf %100, %100 : vector<16x128xf32>
    %cst_57 = arith.constant dense<0.000000e+00> : vector<128xf32>
    %108 = vector.multi_reduction <add>, %107, %cst_57 [0] : vector<16x128xf32> to vector<128xf32>
    %109 = vector.shape_cast %108 : vector<128xf32> to vector<1x128xf32>
    %cst_58 = arith.constant 6.250000e-02 : f32
    %110 = vector.broadcast %cst_58 : f32 to vector<1x128xf32>
    %111 = arith.mulf %109, %110 : vector<1x128xf32>
    %112 = arith.mulf %106, %106 : vector<1x128xf32>
    %113 = arith.subf %111, %112 : vector<1x128xf32>
    %cst_59 = arith.constant 0.000000e+00 : f32
    %114 = vector.broadcast %cst_59 : f32 to vector<1x128xf32>
    %115 = arith.maximumf %113, %114 : vector<1x128xf32>
    %cst_60 = arith.constant 9.99999974E-6 : f32
    %116 = vector.broadcast %cst_60 : f32 to vector<1x128xf32>
    %117 = arith.addf %115, %116 : vector<1x128xf32>
    %118 = math.rsqrt %117 : vector<1x128xf32>
    %119 = arith.mulf %101, %118 : vector<1x128xf32>
    %120 = arith.mulf %106, %119 : vector<1x128xf32>
    %121 = arith.subf %102, %120 : vector<1x128xf32>
    %122 = vector.broadcast %119 : vector<1x128xf32> to vector<16x128xf32>
    %123 = arith.mulf %100, %122 : vector<16x128xf32>
    %124 = vector.broadcast %121 : vector<1x128xf32> to vector<16x128xf32>
    %125 = arith.addf %123, %124 : vector<16x128xf32>
    %cst_61 = arith.constant 0.000000e+00 : f32
    %126 = vector.broadcast %cst_61 : f32 to vector<16x128xf32>
    %127 = arith.maximumf %125, %126 : vector<16x128xf32>
    %c0_62 = arith.constant 0 : index
    %c0_63 = arith.constant 0 : index
    %128 = vector.load %arg14[%c0_62, %c0_63] : memref<16x128xf32, #tpu.memory_space<vmem>>, vector<16x128xf32>
    tpu.vector_store %arg14[%c0_62, %c0_63], %127 {strides = array<i32>} : memref<16x128xf32, #tpu.memory_space<vmem>>, vector<16x128xf32>,
    return
  }
}

</mosaic_0001>

<bundles_post_ra>
// kernel: graphcnn_forward.1
= control target key start
LH: loop header
LB: loop body
LE: loop exit
PB: predicated region body
PF: predicated region fallthrough
CT: control target
= control target key end

     0   :  { %19 = vsyncpa [#allocation3], 0  ;;  %s930_s0 = inlined_call_operand.vmem [shape: f32[16,16], index: 0, kind: input, shape index: {}]   ;;  %s931_s1 = inlined_call_operand.vmem [shape: f32[16,128], index: 1, kind: input, shape index: {}]   ;;  %s932_s2 = inlined_call_operand.hbm [shape: f32[128,128], index: 2, kind: input, shape index: {}]   ;;  %s933_s3 = inlined_call_operand.vmem [shape: f32[1,128], index: 3, kind: input, shape index: {}]   ;;  %s934_s4 = inlined_call_operand.vmem [shape: f32[1,128], index: 4, kind: input, shape index: {}]   ;;  %s935_s5 = inlined_call_operand.hbm [shape: f32[128,128], index: 5, kind: input, shape index: {}]   ;;  %s936_s6 = inlined_call_operand.vmem [shape: f32[1,128], index: 6, kind: input, shape index: {}]   ;;  %s937_s7 = inlined_call_operand.vmem [shape: f32[1,128], index: 7, kind: input, shape index: {}]   ;;  %s938_s8 = inlined_call_operand.hbm [shape: f32[128,128], index: 8, kind: input, shape index: {}]   ;;  %s939_s9 = inlined_call_operand.vmem [shape: f32[1,128], index: 9, kind: input, shape index: {}]   ;;  %s940_s10 = inlined_call_operand.vmem [shape: f32[1,128], index: 10, kind: input, shape index: {}]   ;;  %s941_s11 = inlined_call_operand.hbm [shape: f32[128,128], index: 11, kind: input, shape index: {}]   ;;  %s942_s12 = inlined_call_operand.vmem [shape: f32[1,128], index: 12, kind: input, shape index: {}]   ;;  %s943_s13 = inlined_call_operand.vmem [shape: f32[1,128], index: 13, kind: input, shape index: {}]   ;;  %s944_s14 = inlined_call_operand.hbm [shape: f32[16,128], index: 14, kind: output, shape index: {}]  }
   0x1   :  { %20 = vsyncpa [#allocation6], 0 }
   0x2   :  { %21 = vsyncpa [#allocation9], 0 }
   0x3   :  { %22 = vsyncpa [#allocation4], 0  ;;  %s48_s15 = sshll.u32 %s935_s5, 4  ;;  %s734_s16 = smov [#allocation5]   ;;  %s49_s15 = int_to_ptr.hbm [resolvable:$true] %s48_s15 }
   0x4   :  { %s50_s17 = sshll.u32 %s734_s16, 4  ;;  %s31_s20 = sshll.u32 %s932_s2, 4  ;;  %s51_s17 = int_to_ptr.vmem [resolvable:$true] %s50_s17  ;;  %s32_s20 = int_to_ptr.hbm [resolvable:$true] %s31_s20 }
   0x5   :  { %s735_s21 = smov 128   ;;  %s736_s22 = smov 8  }
   0x6   :  { %56 = dma.hbm_to_vmem [thread:$0]  %s49_s15, 2048, %s51_s17, [#allocation6], %s735_s21, %s735_s21, %s736_s22  }
   0x7   :  { %s737_s23 = smov [#allocation2]   ;;  %s65_s5 = sshll.u32 %s938_s8, 4  ;;  %s66_s5 = int_to_ptr.hbm [resolvable:$true] %s65_s5 }
   0x8   :  { %s33_s24 = sshll.u32 %s737_s23, 4  ;;  %s82_s28 = sshll.u32 %s941_s11, 4  ;;  %s34_s24 = int_to_ptr.vmem [resolvable:$true] %s33_s24  ;;  %s83_s28 = int_to_ptr.hbm [resolvable:$true] %s82_s28 }
   0x9   :  { %39 = dma.hbm_to_vmem [thread:$0]  %s32_s20, 2048, %s34_s24, [#allocation3], %s735_s21, %s735_s21, %s736_s22  }
   0xa   :  { %s738_s29 = smov [#allocation7]   ;;  %s739_s15 = smov [#allocation8]  }
   0xb   :  { %s67_s30 = sshll.u32 %s738_s29, 4  ;;  %s84_s8 = sshll.u32 %s739_s15, 4  ;;  %s68_s30 = int_to_ptr.vmem [resolvable:$true] %s67_s30  ;;  %s85_s8 = int_to_ptr.vmem [resolvable:$true] %s84_s8 }
   0xc   :  { %73 = dma.hbm_to_vmem [thread:$0]  %s66_s5, 2048, %s68_s30, [#allocation6], %s735_s21, %s735_s21, %s736_s22  }
   0xd   :  { %90 = dma.hbm_to_vmem [thread:$0]  %s83_s28, 2048, %s85_s8, [#allocation9], %s735_s21, %s735_s21, %s736_s22  }
   0xe   :  { %726 = dma.done.wait [#allocation3], 2048  }
   0xf   :  { %727 = vsyncadd [#allocation3], 4294965248 }
  0x10   :  { %728 = dma.done.wait [#allocation6], 4096  }
  0x11   :  { %729 = vsyncadd [#allocation6], 4294963200 }
  0x12   :  { %730 = dma.done.wait [#allocation9], 2048  }
  0x13   :  { %731 = vsyncadd [#allocation9], 4294965248  ;;  %vm115_vm0 = vcmask 130048   ;;  %v843_v0 = vld [vmem:[%s930_s0] sm:$0xff]  ;;  %v114_v1 = vld [vmem:[%s931_s1 + $0x8] sm:$0xff]  ;;  %s740_s15 = smov [#allocation10]  }
  0x14   :  { %v113_v2 = vld [vmem:[%s931_s1] sm:$0xff]  ;;  %v116_v3 = vsel %vm115_vm0, %v843_v0, 0.0  ;;  %172 = vmatpush.msra.mxu0 %v114_v1  ;;  %v198_v4 = vld [vmem:[#allocation2 + $0x78] sm:$0xff]  ;;  %v197_v5 = vld [vmem:[#allocation2 + $0x70] sm:$0xff]  ;;  %s566_s8 = sshll.u32 %s740_s15, 4  ;;  %s568_s16 = sshll.u32 %s944_s14, 4  ;;  %s567_s8 = int_to_ptr.vmem [resolvable:$true] %s566_s8  ;;  %s569_s16 = int_to_ptr.hbm [resolvable:$true] %s568_s16 }
  0x15   :  { %117 = vadd.xlane.f32.xlu0 %v116_v3  ;;  %199 = vmatpush.msra.mxu1 %v198_v4  ;;  %v196_v6 = vld [vmem:[#allocation2 + $0x68] sm:$0xff]  ;;  %v195_v8 = vld [vmem:[#allocation2 + $0x60] sm:$0xff]  ;;  %v194_v10 = vld [vmem:[#allocation2 + $0x58] sm:$0xff] }
  0x16   :  { %173 = vmatpush.msra.mxu0 %v113_v2  ;;  %v858_v7 = vld [vmem:[%s930_s0 + $0x8] sm:$0xff]  ;;  %v193_v11 = vld [vmem:[#allocation2 + $0x50] sm:$0xff]  ;;  %v191_v13 = vld [vmem:[#allocation2 + $0x40] sm:$0xff] }
  0x17   :  { %583 = vmatmul.msk.f32.vlgmr.msra.gmra.mxu0 %vm115_vm0, %v843_v0  ;;  %200 = vmatpush.msra.mxu1 %v197_v5  ;;  %v119_v9 = vsel %vm115_vm0, %v858_v7, 0.0  ;;  %v192_v12 = vld [vmem:[#allocation2 + $0x48] sm:$0xff]  ;;  %v190_v14 = vld [vmem:[#allocation2 + $0x38] sm:$0xff]  ;;  %v189_v15 = vld [vmem:[#allocation2 + $0x30] sm:$0xff] }
  0x18   :  { %v188_v16 = vld [vmem:[#allocation2 + $0x28] sm:$0xff]  ;;  %v187_v17 = vld [vmem:[#allocation2 + $0x20] sm:$0xff]  ;;  %v186_v18 = vld [vmem:[#allocation2 + $0x18] sm:$0xff] }
  0x19   :  { %201 = vmatpush.msra.mxu1 %v196_v6  ;;  %v185_v19 = vld [vmem:[#allocation2 + $0x10] sm:$0xff]  ;;  %v184_v20 = vld [vmem:[#allocation2 + $0x8] sm:$0xff]  ;;  %v183_v21 = vld [vmem:[#allocation2] sm:$0xff] }
  0x1a   :  { %v286_v48 = vld [vmem:[#allocation5 + $0x78] sm:$0xff]  ;;  %v285_v50 = vld [vmem:[#allocation5 + $0x70] sm:$0xff]  ;;  %v284_v51 = vld [vmem:[#allocation5 + $0x68] sm:$0xff] }
  0x1b   :  { %202 = vmatpush.msra.mxu1 %v195_v8  ;;  %287 = vmatpush.msra.mxu2 %v286_v48  ;;  %v283_v52 = vld [vmem:[#allocation5 + $0x60] sm:$0xff]  ;;  %v282_v53 = vld [vmem:[#allocation5 + $0x58] sm:$0xff]  ;;  %v281_v58 = vld [vmem:[#allocation5 + $0x50] sm:$0xff] }
  0x1c   :  { %v280_v61 = vld [vmem:[#allocation5 + $0x48] sm:$0xff]  ;;  %v279_v1 = vld [vmem:[#allocation5 + $0x40] sm:$0xff]  ;;  %v278_v4 = vld [vmem:[#allocation5 + $0x38] sm:$0xff] }
  0x1d   :  { %120 = vadd.xlane.f32.xlu0 %v119_v9  ;;  %203 = vmatpush.msra.mxu1 %v194_v10  ;;  %v277_v8 = vld [vmem:[#allocation5 + $0x30] sm:$0xff] }
  0x1e   :  { %288 = vmatpush.msra.mxu2 %v285_v50 }
  0x1f   :  { %584 = vmatmul.msk.f32.gmra.mxu0 %vm115_vm0, %v858_v7  ;;  %204 = vmatpush.msra.mxu1 %v193_v11  ;;  %v276_v11 = vld [vmem:[#allocation5 + $0x28] sm:$0xff] }
  0x20   :  { %289 = vmatpush.msra.mxu2 %v284_v51 }
  0x21   :  { %205 = vmatpush.msra.mxu1 %v192_v12 }
  0x22   :  { %290 = vmatpush.msra.mxu2 %v283_v52 }
  0x23   :  { %206 = vmatpush.msra.mxu1 %v191_v13 }
  0x24   :  { %291 = vmatpush.msra.mxu2 %v282_v53 }
  0x25   :  { %207 = vmatpush.msra.mxu1 %v190_v14  ;;  %v275_v14 = vld [vmem:[#allocation5 + $0x20] sm:$0xff] }
  0x26   :  { %292 = vmatpush.msra.mxu2 %v281_v58 }
  0x27   :  { %208 = vmatpush.msra.mxu1 %v189_v15 }
  0x28   :  { %293 = vmatpush.msra.mxu2 %v280_v61 }
  0x29   :  { %209 = vmatpush.msra.mxu1 %v188_v16 }
  0x2a   :  { %294 = vmatpush.msra.mxu2 %v279_v1 }
  0x2b   :  { %210 = vmatpush.msra.mxu1 %v187_v17  ;;  %v274_v17 = vld [vmem:[#allocation5 + $0x18] sm:$0xff] }
  0x2c   :  { %295 = vmatpush.msra.mxu2 %v278_v4 }
  0x2d   :  { %211 = vmatpush.msra.mxu1 %v186_v18  ;;  %v273_v18 = vld [vmem:[#allocation5 + $0x10] sm:$0xff] }
  0x2e   :  { %296 = vmatpush.msra.mxu2 %v277_v8 }
  0x2f   :  { %212 = vmatpush.msra.mxu1 %v185_v19 }
  0x30   :  { %297 = vmatpush.msra.mxu2 %v276_v11 }
  0x31   :  { %213 = vmatpush.msra.mxu1 %v184_v20 }
  0x32   :  { %298 = vmatpush.msra.mxu2 %v275_v14  ;;  %v398_v14 = vld [vmem:[#allocation7 + $0x70] sm:$0xff] }
  0x33   :  { %214 = vmatpush.msra.mxu1 %v183_v21  ;;  %v272_v21 = vld [vmem:[#allocation5 + $0x8] sm:$0xff] }
  0x34   :  { %299 = vmatpush.msra.mxu2 %v274_v17 }
  0x36   :  { %300 = vmatpush.msra.mxu2 %v273_v18  ;;  %v396_v18 = vld [vmem:[#allocation7 + $0x60] sm:$0xff] }
  0x38   :  { %301 = vmatpush.msra.mxu2 %v272_v21  ;;  %v395_v21 = vld [vmem:[#allocation7 + $0x58] sm:$0xff] }
  0x88   :  { %v118_v22 = vpop.xlane.xlu0 %117 }
  0x89   :  { %594 = vrcp.f32 %v118_v22  ;;  %v133_v27 = vand.u32 2147483648, %v118_v22  ;;  %v131_v29 = vand.u32 2147483647, %v118_v22  ;;  %vm127_vm2 = vweird.f32 %v118_v22 }
  0x8b   :  { %v134_v33 = vor.u32 1.1754944e-38, %v133_v27  ;;  %vm132_vm4 = vcmp.eq.f32.partialorder %v131_v29, 8.507059e+37 }
  0x8f   :  { %v595_v23 = vpop.eup %594 }
  0x90   :  { %v123_v24 = vmul.f32 %v595_v23, %v118_v22  ;;  %v121_v25 = vpop.xlane.xlu0 %120  ;;  %vm128_vm1 = vweird.f32 %v595_v23 }
  0x91   :  { %596 = vrcp.f32 %v121_v25  ;;  %vm129_vm3 = vmor %vm127_vm2, %vm128_vm1  ;;  %v148_v39 = vand.u32 2147483648, %v121_v25  ;;  %v146_v41 = vand.u32 2147483647, %v121_v25  ;;  %vm142_vm6 = vweird.f32 %v121_v25 }
  0x92   :  { %v124_v26 = vsub.f32 1.0, %v123_v24 }
  0x93   :  { %v149_v43 = vor.u32 1.1754944e-38, %v148_v39  ;;  %vm147_vm8 = vcmp.eq.f32.partialorder %v146_v41, 8.507059e+37 }
  0x94   :  { %v125_v28 = vmul.f32 %v595_v23, %v124_v26  ;;  %v175_v30 = vpop.f32.mrf.mxu0 }
  0x96   :  { %v126_v31 = vadd.f32 %v595_v23, %v125_v28 }
  0x97   :  { %v597_v32 = vpop.eup %596 }
  0x98   :  { %v138_v34 = vmul.f32 %v597_v32, %v121_v25  ;;  %v130_v35 = vsel %vm129_vm3, %v595_v23, %v126_v31  ;;  %vm143_vm5 = vweird.f32 %v597_v32  ;;  %v271_v23 = vld [vmem:[#allocation5] sm:$0xff] }
  0x99   :  { %v864_v36 = vsel %vm132_vm4, %v134_v33, %v130_v35  ;;  %vm144_vm7 = vmor %vm142_vm6, %vm143_vm5  ;;  %302 = vmatpush.msra.mxu2 %v271_v23  ;;  %v222_v31 = vld [vmem:[%s933_s3] sm:$0x1]  ;;  %v394_v23 = vld [vmem:[#allocation7 + $0x50] sm:$0xff] }
  0x9a   :  { %v139_v37 = vsub.f32 1.0, %v138_v34  ;;  %v181_v38 = vmul.f32 %v175_v30, %v864_v36  ;;  %v223_v35 = vld [vmem:[%s934_s4] sm:$0x1] }
  0x9c   :  { %v140_v40 = vmul.f32 %v597_v32, %v139_v37  ;;  %215 = vmatmul.f32.vlgmr.msra.gmra.mxu1 %v181_v38  ;;  %v178_v44 = vpop.f32.mrf.mxu0 }
  0x9e   :  { %v141_v42 = vadd.f32 %v597_v32, %v140_v40 }
  0xa0   :  { %v145_v45 = vsel %vm144_vm7, %v597_v32, %v141_v42 }
  0xa1   :  { %v867_v46 = vsel %vm147_vm8, %v149_v43, %v145_v45 }
  0xa2   :  { %v182_v47 = vmul.f32 %v178_v44, %v867_v46 }
  0xa4   :  { %218 = vmatmul.f32.gmra.mxu1 %v182_v47 }
 0x119   :  { %v870_v49 = vpop.f32.mrf.mxu1 }
 0x11a   :  { %v232_v55 = vmul.f32 %v870_v49, %v870_v49 }
 0x121   :  { %v872_v54 = vpop.f32.mrf.mxu1 }
 0x122   :  { %v224_v56 = vadd.f32 %v872_v54, %v870_v49  ;;  %v233_v57 = vmul.f32 %v872_v54, %v872_v54 }
 0x124   :  { %v225_v59 = vrot.slane %v224_v56, 4  ;;  %v234_v60 = vadd.f32 %v233_v57, %v232_v55 }
 0x126   :  { %v226_v62 = vadd.f32 %v225_v59, %v224_v56  ;;  %v235_v63 = vrot.slane %v234_v60, 4 }
 0x128   :  { %v227_v2 = vrot.slane %v226_v62, 2  ;;  %v236_v3 = vadd.f32 %v235_v63, %v234_v60 }
 0x12a   :  { %v228_v5 = vadd.f32 %v227_v2, %v226_v62  ;;  %v237_v6 = vrot.slane %v236_v3, 2 }
 0x12c   :  { %v229_v9 = vrot.slane %v228_v5, 1  ;;  %v238_v10 = vadd.f32 %v237_v6, %v236_v3 }
 0x12e   :  { %v230_v12 = vadd.f32 %v229_v9, %v228_v5  ;;  %v239_v13 = vrot.slane %v238_v10, 1 }
 0x130   :  { %v231_v15 = vmul.f32 0.0625, %v230_v12  ;;  %v240_v16 = vadd.f32 %v239_v13, %v238_v10  ;;  %v399_v13 = vld [vmem:[#allocation7 + $0x78] sm:$0xff] }
 0x131   :  { %400 = vmatpush.msrb.mxu0 %v399_v13 }
 0x132   :  { %v241_v19 = vmul.f32 0.0625, %v240_v16  ;;  %v242_v20 = vmul.f32 %v231_v15, %v231_v15  ;;  %v397_v16 = vld [vmem:[#allocation7 + $0x68] sm:$0xff] }
 0x133   :  { %401 = vmatpush.msrb.mxu0 %v398_v14  ;;  %v476_v14 = vld [vmem:[#allocation8 + $0x20] sm:$0xff] }
 0x134   :  { %v243_v22 = vsub.f32 %v241_v19, %v242_v20  ;;  %v310_v19 = vld [vmem:[%s936_s6] sm:$0x1] }
 0x135   :  { %402 = vmatpush.msrb.mxu0 %v397_v16 }
 0x136   :  { %v244_v24 = vmax.f32 %v243_v22, 0.0 }
 0x137   :  { %403 = vmatpush.msrb.mxu0 %v396_v18  ;;  %v474_v18 = vld [vmem:[#allocation8 + $0x10] sm:$0xff] }
 0x138   :  { %v245_v25 = vadd.f32 1e-05, %v244_v24 }
 0x139   :  { %404 = vmatpush.msrb.mxu0 %v395_v21  ;;  %v473_v21 = vld [vmem:[#allocation8 + $0x8] sm:$0xff] }
 0x13a   :  { %598 = vrsqrt.f32 %v245_v25  ;;  %vm252_vm10 = vweird.f32 %v245_v25 }
 0x13b   :  { %405 = vmatpush.msrb.mxu0 %v394_v23  ;;  %v472_v23 = vld [vmem:[#allocation8] sm:$0xff] }
 0x140   :  { %v599_v26 = vpop.eup %598 }
 0x141   :  { %v247_v27 = vmul.f32 %v599_v26, %v245_v25  ;;  %vm253_vm9 = vweird.f32 %v599_v26  ;;  %v311_v25 = vld [vmem:[%s937_s7] sm:$0x1] }
 0x142   :  { %vm254_vm11 = vmor %vm252_vm10, %vm253_vm9 }
 0x143   :  { %v248_v28 = vmul.f32 %v599_v26, %v247_v27 }
 0x145   :  { %v249_v29 = vmul.f32 0.5, %v248_v28 }
 0x147   :  { %v250_v30 = vsub.f32 1.5, %v249_v29  ;;  %v392_v29 = vld [vmem:[#allocation7 + $0x40] sm:$0xff] }
 0x149   :  { %v251_v32 = vmul.f32 %v599_v26, %v250_v30 }
 0x14b   :  { %v255_v33 = vsel %vm254_vm11, %v599_v26, %v251_v32  ;;  %v393_v26 = vld [vmem:[#allocation7 + $0x48] sm:$0xff] }
 0x14c   :  { %v256_v34 = vmul.f32 %v255_v33, %v222_v31  ;;  %406 = vmatpush.msrb.mxu0 %v393_v26  ;;  %v391_v31 = vld [vmem:[#allocation7 + $0x38] sm:$0xff] }
 0x14e   :  { %v260_v37 = vperm.slane %v256_v34, 0  ;;  %v257_v38 = vmul.f32 %v256_v34, %v231_v15  ;;  %407 = vmatpush.msrb.mxu0 %v392_v29 }
 0x150   :  { %v258_v39 = vsub.f32 %v223_v35, %v257_v38  ;;  %v262_v40 = vmul.f32 %v260_v37, %v870_v49  ;;  %v263_v44 = vmul.f32 %v260_v37, %v872_v54  ;;  %v390_v35 = vld [vmem:[#allocation7 + $0x30] sm:$0xff]  ;;  %408 = vmatpush.msrb.mxu0 %v391_v31  ;;  %v423_v31 = vld [vmem:[%s939_s9] sm:$0x1] }
 0x152   :  { %v265_v41 = vperm.slane %v258_v39, 0  ;;  %v389_v39 = vld [vmem:[#allocation7 + $0x28] sm:$0xff]  ;;  %409 = vmatpush.msrb.mxu0 %v390_v35  ;;  %v424_v35 = vld [vmem:[%s940_s10] sm:$0x1] }
 0x154   :  { %v267_v42 = vadd.f32 %v265_v41, %v262_v40  ;;  %v268_v45 = vadd.f32 %v265_v41, %v263_v44  ;;  %v388_v41 = vld [vmem:[#allocation7 + $0x20] sm:$0xff]  ;;  %410 = vmatpush.msrb.mxu0 %v389_v39  ;;  %v386_v44 = vld [vmem:[#allocation7 + $0x10] sm:$0xff] }
 0x156   :  { %v269_v43 = vmax.f32 %v267_v42, 0.0  ;;  %v270_v47 = vmax.f32 %v268_v45, 0.0  ;;  %411 = vmatpush.msrb.mxu0 %v388_v41  ;;  %v385_v45 = vld [vmem:[#allocation7 + $0x8] sm:$0xff] }
 0x158   :  { %303 = vmatmul.f32.vlgmr.msra.gmra.mxu2 %v269_v43  ;;  %v387_v43 = vld [vmem:[#allocation7 + $0x18] sm:$0xff] }
 0x159   :  { %412 = vmatpush.msrb.mxu0 %v387_v43 }
 0x15b   :  { %413 = vmatpush.msrb.mxu0 %v386_v44 }
 0x15d   :  { %414 = vmatpush.msrb.mxu0 %v385_v45 }
 0x160   :  { %306 = vmatmul.f32.gmra.mxu2 %v270_v47  ;;  %v384_v47 = vld [vmem:[#allocation7] sm:$0xff] }
 0x161   :  { %415 = vmatpush.msrb.mxu0 %v384_v47 }
 0x1db   :  { %v304_v48 = vpop.f32.mrf.mxu2 }
 0x1dc   :  { %v320_v51 = vmul.f32 %v304_v48, %v304_v48 }
 0x1e3   :  { %v307_v50 = vpop.f32.mrf.mxu2 }
 0x1e4   :  { %v312_v52 = vadd.f32 %v307_v50, %v304_v48  ;;  %v321_v53 = vmul.f32 %v307_v50, %v307_v50 }
 0x1e6   :  { %v313_v55 = vrot.slane %v312_v52, 4  ;;  %v322_v56 = vadd.f32 %v321_v53, %v320_v51  ;;  %v487_v53 = vld [vmem:[#allocation8 + $0x78] sm:$0xff] }
 0x1e8   :  { %v314_v57 = vadd.f32 %v313_v55, %v312_v52  ;;  %v323_v58 = vrot.slane %v322_v56, 4  ;;  %v486_v55 = vld [vmem:[#allocation8 + $0x70] sm:$0xff] }
 0x1ea   :  { %v315_v59 = vrot.slane %v314_v57, 2  ;;  %v324_v49 = vadd.f32 %v323_v58, %v322_v56  ;;  %v485_v56 = vld [vmem:[#allocation8 + $0x68] sm:$0xff] }
 0x1ec   :  { %v316_v60 = vadd.f32 %v315_v59, %v314_v57  ;;  %v325_v61 = vrot.slane %v324_v49, 2  ;;  %v483_v57 = vld [vmem:[#allocation8 + $0x58] sm:$0xff] }
 0x1ee   :  { %v317_v62 = vrot.slane %v316_v60, 1  ;;  %v326_v63 = vadd.f32 %v325_v61, %v324_v49  ;;  %v482_v49 = vld [vmem:[#allocation8 + $0x50] sm:$0xff] }
 0x1f0   :  { %v318_v54 = vadd.f32 %v317_v62, %v316_v60  ;;  %v327_v1 = vrot.slane %v326_v63, 1  ;;  %v481_v62 = vld [vmem:[#allocation8 + $0x48] sm:$0xff] }
 0x1f2   :  { %v319_v2 = vmul.f32 0.0625, %v318_v54  ;;  %v328_v3 = vadd.f32 %v327_v1, %v326_v63  ;;  %v480_v1 = vld [vmem:[#allocation8 + $0x40] sm:$0xff] }
 0x1f4   :  { %v329_v4 = vmul.f32 0.0625, %v328_v3  ;;  %v330_v5 = vmul.f32 %v319_v2, %v319_v2 }
 0x1f6   :  { %v331_v6 = vsub.f32 %v329_v4, %v330_v5  ;;  %v479_v4 = vld [vmem:[#allocation8 + $0x38] sm:$0xff] }
 0x1f8   :  { %v332_v8 = vmax.f32 %v331_v6, 0.0 }
 0x1fa   :  { %v333_v9 = vadd.f32 1e-05, %v332_v8  ;;  %v478_v8 = vld [vmem:[#allocation8 + $0x30] sm:$0xff] }
 0x1fc   :  { %600 = vrsqrt.f32 %v333_v9  ;;  %vm340_vm13 = vweird.f32 %v333_v9 }
 0x202   :  { %v601_v10 = vpop.eup %600 }
 0x203   :  { %v335_v11 = vmul.f32 %v601_v10, %v333_v9  ;;  %vm341_vm12 = vweird.f32 %v601_v10 }
 0x204   :  { %vm342_vm14 = vmor %vm340_vm13, %vm341_vm12 }
 0x205   :  { %v336_v12 = vmul.f32 %v601_v10, %v335_v11  ;;  %v477_v11 = vld [vmem:[#allocation8 + $0x28] sm:$0xff] }
 0x207   :  { %v337_v15 = vmul.f32 0.5, %v336_v12 }
 0x209   :  { %v338_v17 = vsub.f32 1.5, %v337_v15 }
 0x20b   :  { %v339_v20 = vmul.f32 %v601_v10, %v338_v17  ;;  %v475_v17 = vld [vmem:[#allocation8 + $0x18] sm:$0xff] }
 0x20d   :  { %v343_v22 = vsel %vm342_vm14, %v601_v10, %v339_v20 }
 0x20e   :  { %v344_v24 = vmul.f32 %v343_v22, %v310_v19 }
 0x210   :  { %v348_v27 = vperm.slane %v344_v24, 0  ;;  %v345_v28 = vmul.f32 %v344_v24, %v319_v2 }
 0x212   :  { %v346_v30 = vsub.f32 %v311_v25, %v345_v28  ;;  %v351_v32 = vmul.f32 %v348_v27, %v307_v50  ;;  %v350_v34 = vmul.f32 %v348_v27, %v304_v48 }
 0x214   :  { %v353_v33 = vperm.slane %v346_v30, 0 }
 0x216   :  { %v356_v37 = vadd.f32 %v353_v33, %v351_v32  ;;  %v355_v38 = vadd.f32 %v353_v33, %v350_v34 }
 0x218   :  { %v358_v40 = vmax.f32 %v356_v37, 0.0  ;;  %v357_v42 = vmax.f32 %v355_v38, 0.0 }
 0x21a   :  { %373 = vmatpush.msra.mxu3 %v358_v40 }
 0x21c   :  { %374 = vmatpush.msra.mxu3 %v357_v42 }
 0x21d   :  { %585 = vmatmul.msk.f32.vlgmr.msra.gmra.mxu3 %vm115_vm0, %v843_v0 }
 0x21e   :  { %488 = vmatpush.msrb.mxu3 %v487_v53 }
 0x220   :  { %489 = vmatpush.msrb.mxu3 %v486_v55 }
 0x222   :  { %490 = vmatpush.msrb.mxu3 %v485_v56 }
 0x225   :  { %586 = vmatmul.msk.f32.gmra.mxu3 %vm115_vm0, %v858_v7  ;;  %v484_v7 = vld [vmem:[#allocation8 + $0x60] sm:$0xff] }
 0x226   :  { %491 = vmatpush.msrb.mxu3 %v484_v7 }
 0x228   :  { %492 = vmatpush.msrb.mxu3 %v483_v57 }
 0x22a   :  { %493 = vmatpush.msrb.mxu3 %v482_v49 }
 0x22c   :  { %494 = vmatpush.msrb.mxu3 %v481_v62 }
 0x22e   :  { %495 = vmatpush.msrb.mxu3 %v480_v1 }
 0x230   :  { %496 = vmatpush.msrb.mxu3 %v479_v4 }
 0x232   :  { %497 = vmatpush.msrb.mxu3 %v478_v8 }
 0x234   :  { %498 = vmatpush.msrb.mxu3 %v477_v11  ;;  %v511_v11 = vld [vmem:[%s942_s12] sm:$0x1] }
 0x236   :  { %499 = vmatpush.msrb.mxu3 %v476_v14 }
 0x238   :  { %500 = vmatpush.msrb.mxu3 %v475_v17 }
 0x23a   :  { %501 = vmatpush.msrb.mxu3 %v474_v18 }
 0x23c   :  { %502 = vmatpush.msrb.mxu3 %v473_v21 }
 0x23e   :  { %503 = vmatpush.msrb.mxu3 %v472_v23 }
 0x2a0   :  { %v376_v48 = vpop.f32.mrf.mxu3 }
 0x2a1   :  { %v382_v50 = vmul.f32 %v376_v48, %v864_v36 }
 0x2a3   :  { %416 = vmatmul.f32.vlgmr.msrb.gmra.mxu0 %v382_v50 }
 0x2a8   :  { %v379_v51 = vpop.f32.mrf.mxu3 }
 0x2a9   :  { %v383_v52 = vmul.f32 %v379_v51, %v867_v46 }
 0x2ab   :  { %419 = vmatmul.f32.gmra.mxu0 %v383_v52 }
 0x320   :  { %v900_v0 = vpop.f32.mrf.mxu0 }
 0x321   :  { %v433_v36 = vmul.f32 %v900_v0, %v900_v0 }
 0x328   :  { %v902_v58 = vpop.f32.mrf.mxu0 }
 0x329   :  { %v425_v46 = vadd.f32 %v902_v58, %v900_v0  ;;  %v434_v59 = vmul.f32 %v902_v58, %v902_v58 }
 0x32b   :  { %v426_v60 = vrot.slane %v425_v46, 4  ;;  %v435_v61 = vadd.f32 %v434_v59, %v433_v36 }
 0x32d   :  { %v427_v63 = vadd.f32 %v426_v60, %v425_v46  ;;  %v436_v54 = vrot.slane %v435_v61, 4 }
 0x32f   :  { %v428_v2 = vrot.slane %v427_v63, 2  ;;  %v437_v3 = vadd.f32 %v436_v54, %v435_v61 }
 0x331   :  { %v429_v5 = vadd.f32 %v428_v2, %v427_v63  ;;  %v438_v6 = vrot.slane %v437_v3, 2 }
 0x333   :  { %v430_v9 = vrot.slane %v429_v5, 1  ;;  %v439_v10 = vadd.f32 %v438_v6, %v437_v3 }
 0x335   :  { %v431_v12 = vadd.f32 %v430_v9, %v429_v5  ;;  %v440_v13 = vrot.slane %v439_v10, 1 }
 0x337   :  { %v432_v15 = vmul.f32 0.0625, %v431_v12  ;;  %v441_v16 = vadd.f32 %v440_v13, %v439_v10 }
 0x339   :  { %v442_v19 = vmul.f32 0.0625, %v441_v16  ;;  %v443_v20 = vmul.f32 %v432_v15, %v432_v15 }
 0x33b   :  { %v444_v22 = vsub.f32 %v442_v19, %v443_v20 }
 0x33d   :  { %v445_v24 = vmax.f32 %v444_v22, 0.0 }
 0x33f   :  { %v446_v25 = vadd.f32 1e-05, %v445_v24 }
 0x341   :  { %602 = vrsqrt.f32 %v446_v25  ;;  %vm453_vm0 = vweird.f32 %v446_v25 }
 0x347   :  { %v603_v26 = vpop.eup %602 }
 0x348   :  { %v448_v27 = vmul.f32 %v603_v26, %v446_v25  ;;  %vm454_vm15 = vweird.f32 %v603_v26 }
 0x349   :  { %vm455_vm1 = vmor %vm453_vm0, %vm454_vm15 }
 0x34a   :  { %v449_v28 = vmul.f32 %v603_v26, %v448_v27 }
 0x34c   :  { %v450_v29 = vmul.f32 0.5, %v449_v28 }
 0x34e   :  { %v451_v30 = vsub.f32 1.5, %v450_v29 }
 0x350   :  { %v452_v32 = vmul.f32 %v603_v26, %v451_v30 }
 0x352   :  { %v456_v33 = vsel %vm455_vm1, %v603_v26, %v452_v32 }
 0x353   :  { %v457_v34 = vmul.f32 %v456_v33, %v423_v31 }
 0x355   :  { %v458_v37 = vmul.f32 %v457_v34, %v432_v15  ;;  %v461_v38 = vperm.slane %v457_v34, 0  ;;  %v512_v15 = vld [vmem:[%s943_s13] sm:$0x1] }
 0x357   :  { %v459_v39 = vsub.f32 %v424_v35, %v458_v37  ;;  %v463_v40 = vmul.f32 %v461_v38, %v900_v0  ;;  %v464_v44 = vmul.f32 %v461_v38, %v902_v58 }
 0x359   :  { %v466_v41 = vperm.slane %v459_v39, 0 }
 0x35b   :  { %v468_v42 = vadd.f32 %v466_v41, %v463_v40  ;;  %v469_v45 = vadd.f32 %v466_v41, %v464_v44 }
 0x35d   :  { %v470_v43 = vmax.f32 %v468_v42, 0.0  ;;  %v471_v47 = vmax.f32 %v469_v45, 0.0 }
 0x35f   :  { %504 = vmatmul.f32.vlgmr.msrb.gmra.mxu3 %v470_v43 }
 0x367   :  { %507 = vmatmul.f32.gmra.mxu3 %v471_v47 }
 0x3e2   :  { %v505_v48 = vpop.f32.mrf.mxu3 }
 0x3e3   :  { %v521_v51 = vmul.f32 %v505_v48, %v505_v48 }
 0x3ea   :  { %v508_v50 = vpop.f32.mrf.mxu3 }
 0x3eb   :  { %v513_v52 = vadd.f32 %v508_v50, %v505_v48  ;;  %v522_v53 = vmul.f32 %v508_v50, %v508_v50 }
 0x3ed   :  { %v514_v55 = vrot.slane %v513_v52, 4  ;;  %v523_v56 = vadd.f32 %v522_v53, %v521_v51 }
 0x3ef   :  { %v515_v7 = vadd.f32 %v514_v55, %v513_v52  ;;  %v524_v57 = vrot.slane %v523_v56, 4 }
 0x3f1   :  { %v516_v36 = vrot.slane %v515_v7, 2  ;;  %v525_v0 = vadd.f32 %v524_v57, %v523_v56 }
 0x3f3   :  { %v517_v46 = vadd.f32 %v516_v36, %v515_v7  ;;  %v526_v59 = vrot.slane %v525_v0, 2 }
 0x3f5   :  { %v518_v49 = vrot.slane %v517_v46, 1  ;;  %v527_v60 = vadd.f32 %v526_v59, %v525_v0 }
 0x3f7   :  { %v519_v58 = vadd.f32 %v518_v49, %v517_v46  ;;  %v528_v61 = vrot.slane %v527_v60, 1 }
 0x3f9   :  { %v520_v62 = vmul.f32 0.0625, %v519_v58  ;;  %v529_v63 = vadd.f32 %v528_v61, %v527_v60 }
 0x3fb   :  { %v530_v54 = vmul.f32 0.0625, %v529_v63  ;;  %v531_v1 = vmul.f32 %v520_v62, %v520_v62 }
 0x3fd   :  { %v532_v2 = vsub.f32 %v530_v54, %v531_v1 }
 0x3ff   :  { %v533_v3 = vmax.f32 %v532_v2, 0.0 }
 0x401   :  { %v534_v4 = vadd.f32 1e-05, %v533_v3 }
 0x403   :  { %604 = vrsqrt.f32 %v534_v4  ;;  %vm541_vm3 = vweird.f32 %v534_v4 }
 0x409   :  { %v605_v5 = vpop.eup %604 }
 0x40a   :  { %v536_v6 = vmul.f32 %v605_v5, %v534_v4  ;;  %vm542_vm2 = vweird.f32 %v605_v5 }
 0x40b   :  { %vm543_vm4 = vmor %vm541_vm3, %vm542_vm2 }
 0x40c   :  { %v537_v8 = vmul.f32 %v605_v5, %v536_v6 }
 0x40e   :  { %v538_v9 = vmul.f32 0.5, %v537_v8 }
 0x410   :  { %v539_v10 = vsub.f32 1.5, %v538_v9 }
 0x412   :  { %v540_v12 = vmul.f32 %v605_v5, %v539_v10 }
 0x414   :  { %v544_v13 = vsel %vm543_vm4, %v605_v5, %v540_v12 }
 0x415   :  { %v545_v14 = vmul.f32 %v544_v13, %v511_v11 }
 0x417   :  { %v546_v16 = vmul.f32 %v545_v14, %v520_v62  ;;  %v549_v17 = vperm.slane %v545_v14, 0 }
 0x419   :  { %v547_v18 = vsub.f32 %v512_v15, %v546_v16  ;;  %v551_v19 = vmul.f32 %v549_v17, %v505_v48  ;;  %v552_v20 = vmul.f32 %v549_v17, %v508_v50 }
 0x41b   :  { %v554_v21 = vperm.slane %v547_v18, 0 }
 0x41d   :  { %v556_v22 = vadd.f32 %v554_v21, %v551_v19  ;;  %v557_v23 = vadd.f32 %v554_v21, %v552_v20 }
 0x41f   :  { %v559_v24 = vmax.f32 %v557_v23, 0.0  ;;  %v558_v25 = vmax.f32 %v556_v22, 0.0 }
 0x421   :  { %561 = vst [vmem:[#allocation10 + $0x8] sm:$0xff] %v559_v24 }
 0x422   :  { %560 = vst [vmem:[#allocation10] sm:$0xff] %v558_v25 }
 0x423   :  { %574 = dma.vmem_to_hbm [thread:$0]  %s567_s8, 256, %s569_s16, [#allocation4], %s735_s21, %s735_s21, %s736_s22  }
 0x424   :  { %732 = dma.done.wait [#allocation4], 256  }
 0x425   :  { %733 = vsyncadd [#allocation4], 4294967040 }
 0x426   :  { %579 = vsyncpa [#allocation3], 1 }
 0x427   :  { %580 = vsyncpa [#allocation6], 1 }
 0x428   :  { %581 = vsyncpa [#allocation9], 1 }
 0x429   :  { %582 = vsyncpa [#allocation4], 1 }

</bundles_post_ra>
